<compile_context>
chip_gen: v7x
topology: tpu7x:2x2x1
jax: 0.10.0
libtpu: 0.0.40
codegen_flags: <defaults>
</compile_context>

<pallas_src>
import math
from functools import partial

import jax
import jax.numpy as jnp
from jax.experimental import pallas as pl
from jax.experimental.pallas import tpu as pltpu


def _qkv_proj_kernel(x_ref, w_ref, b_ref, o_ref):
    # x_ref: (1, Tr, D)   w_ref: (1, D, D)   b_ref: (1, 1, D)   o_ref: (1, Tr, D)
    acc = jnp.dot(x_ref[0], w_ref[0], preferred_element_type=jnp.float32)
    o_ref[0] = (acc + b_ref[0]).astype(o_ref.dtype)


def _attention_kernel(q_ref, k_ref, v_ref, wo_ref, bo_ref, o_ref,
                      m_sc, l_sc, acc_sc, *, heads: int):
    ki = pl.program_id(2)

    @pl.when(ki == 0)
    def _():
        m_sc[...] = jnp.full_like(m_sc, -jnp.inf)
        l_sc[...] = jnp.zeros_like(l_sc)
        acc_sc[...] = jnp.zeros_like(acc_sc)

    q = q_ref[0]            # (H, Tq, d_k) — 1/sqrt(d_k) already folded into Wq
    k = k_ref[0]            # (H, Tkv, d_k)
    v = v_ref[0]            # (H, Tkv, d_k)

    # Batched-over-heads scores with f32 MXU accumulation.
    s = jnp.einsum("hqd,hkd->hqk", q, k, preferred_element_type=jnp.float32)

    m_new = jnp.maximum(m_sc[...], s.max(axis=-1, keepdims=True))
    alpha = jnp.exp(m_sc[...] - m_new)
    p = jnp.exp(s - m_new)
    l_sc[...] = alpha * l_sc[...] + p.sum(axis=-1, keepdims=True)
    acc_sc[...] = alpha * acc_sc[...] + jnp.einsum(
        "hqk,hkd->hqd", p.astype(v.dtype), v, preferred_element_type=jnp.float32)
    m_sc[...] = m_new

    # TODO(synk): nn.Dropout on the attention probabilities is identity in eval
    # mode; training-mode dropout (pltpu.prng_*) is not implemented here.

    @pl.when(ki == pl.num_programs(2) - 1)
    def _():
        attn = acc_sc[...] * pl.reciprocal(l_sc[...], approx=True)  # (H, Tq, d_k)
        # Output projection without an in-kernel head concat:
        #   concat_h(attn) @ Wo.T == sum_h attn[h] @ Wo.T[h*d_k:(h+1)*d_k, :]
        tq = attn.shape[1]
        d_model = wo_ref.shape[-1]
        out = jnp.zeros((tq, d_model), jnp.float32)
        for h in range(heads):                      # static unroll, H matmuls
            out = out + jnp.dot(attn[h].astype(wo_ref.dtype), wo_ref[h],
                                preferred_element_type=jnp.float32)
        o_ref[0] = (out + bo_ref[...]).astype(o_ref.dtype)


def multi_head_attention(q, k, v, params, *, heads: int, compute_dtype=None):
    """q, k, v: (B, S, D). params: PyTorch-convention Linear weights (out, in)."""
    B, S, D = q.shape
    assert D % heads == 0, "d_model must be divisible by heads"
    d_k = D // heads
    N = B * S
    if compute_dtype is None:
        compute_dtype = q.dtype          # use jnp.bfloat16 on v6e/v7x
    scale = 1.0 / math.sqrt(d_k)

    # Fused projection params, pre-transposed to (in, out); scale folded into Wq.
    # TODO(synk): for very large D, tile Wo / the fused weight over output
    # columns (extra grid axis) instead of keeping full D x D blocks resident.
    wqkv = jnp.stack([params["wq"].T * scale,
                      params["wk"].T,
                      params["wv"].T], axis=0).astype(compute_dtype)      # (3, D, D)
    bqkv = jnp.stack([params["bq"] * scale,
                      params["bk"],
                      params["bv"]], axis=0).reshape(3, 1, D).astype(jnp.float32)
    wo3 = params["wo"].T.reshape(heads, d_k, D).astype(compute_dtype)      # (H, d_k, D)
    bo = params["bo"].reshape(1, D).astype(jnp.float32)

    # ---- Kernel 1: fused QKV projection over row tiles -------------------
    xs = jnp.stack([q.reshape(N, D), k.reshape(N, D), v.reshape(N, D)],
                   axis=0).astype(compute_dtype)                           # (3, N, D)
    tr = N if N <= 256 else 256
    n_row_tiles = pl.cdiv(N, tr)

    proj = pl.pallas_call(
        _qkv_proj_kernel,
        out_shape=jax.ShapeDtypeStruct((3, N, D), compute_dtype),
        grid_spec=pltpu.PrefetchScalarGridSpec(
            num_scalar_prefetch=0,
            grid=(3, n_row_tiles),
            in_specs=[pl.BlockSpec((1, tr, D), lambda g, r: (g, r, 0)),
                      pl.BlockSpec((1, D, D), lambda g, r: (g, 0, 0)),
                      pl.BlockSpec((1, 1, D), lambda g, r: (g, 0, 0))],
            out_specs=pl.BlockSpec((1, tr, D), lambda g, r: (g, r, 0)),
        ),
        compiler_params=pltpu.CompilerParams(
            dimension_semantics=("parallel", "parallel")),
    )(xs, wqkv, bqkv)

    # Head split outside the kernels (plain XLA reshape/transpose).
    per_head = proj.reshape(3, B, S, heads, d_k).transpose(0, 1, 3, 2, 4)
    qh, kh, vh = per_head[0], per_head[1], per_head[2]      # each (B, H, S, d_k)

    # ---- Kernel 2: flash attention + fused output projection -------------
    tq = S if S <= 256 else 256
    tkv = S if S <= 256 else 256
    assert S % tq == 0 and S % tkv == 0, "sequence length must tile evenly"
    nq, nkv = S // tq, S // tkv

    return pl.pallas_call(
        partial(_attention_kernel, heads=heads),
        out_shape=jax.ShapeDtypeStruct((B, S, D), q.dtype),
        grid_spec=pltpu.PrefetchScalarGridSpec(
            num_scalar_prefetch=0,
            grid=(B, nq, nkv),
            in_specs=[
                pl.BlockSpec((1, heads, tq, d_k), lambda b, qi, ki: (b, 0, qi, 0)),
                pl.BlockSpec((1, heads, tkv, d_k), lambda b, qi, ki: (b, 0, ki, 0)),
                pl.BlockSpec((1, heads, tkv, d_k), lambda b, qi, ki: (b, 0, ki, 0)),
                pl.BlockSpec((heads, d_k, D), lambda b, qi, ki: (0, 0, 0)),
                pl.BlockSpec((1, D), lambda b, qi, ki: (0, 0)),
            ],
            out_specs=pl.BlockSpec((1, tq, D), lambda b, qi, ki: (b, qi, 0)),
            scratch_shapes=[pltpu.VMEM((heads, tq, 1), jnp.float32),
                            pltpu.VMEM((heads, tq, 1), jnp.float32),
                            pltpu.VMEM((heads, tq, d_k), jnp.float32)],
        ),
        compiler_params=pltpu.CompilerParams(
            dimension_semantics=("parallel", "parallel", "arbitrary")),
    )(qh, kh, vh, wo3, bo)


def _reference(q, k, v, params, *, heads: int):
    """Pure-JAX reference mirroring the PyTorch forward (eval mode, no dropout)."""
    B, S, D = q.shape
    d_k = D // heads

    def lin(x, w, b):                       # torch Linear: x @ W^T + b
        return x @ w.T + b

    def split_heads(x):                     # (B,S,D) -> (B,H,S,d_k)
        return x.reshape(B, S, heads, d_k).transpose(0, 2, 1, 3)

    qh = split_heads(lin(q, params["wq"], params["bq"]))
    kh = split_heads(lin(k, params["wk"], params["bk"]))
    vh = split_heads(lin(v, params["wv"], params["bv"]))

    scores = jnp.einsum("bhqd,bhkd->bhqk", qh, kh) / math.sqrt(d_k)
    probs = jax.nn.softmax(scores, axis=-1)
    ctx = jnp.einsum("bhqk,bhkd->bhqd", probs, vh)
    ctx = ctx.transpose(0, 2, 1, 3).reshape(B, S, D)
    return lin(ctx, params["wo"], params["bo"])


if __name__ == "__main__":
    B, S, D, H = 2, 8, 32, 4

    key = jax.random.PRNGKey(0)
    keys = jax.random.split(key, 12)
    bound = 1.0 / math.sqrt(D)

    params = {
        "wq": jax.random.uniform(keys[0], (D, D), jnp.float32, -bound, bound),
        "bq": jax.random.uniform(keys[1], (D,), jnp.float32, -bound, bound),
        "wk": jax.random.uniform(keys[2], (D, D), jnp.float32, -bound, bound),
        "bk": jax.random.uniform(keys[3], (D,), jnp.float32, -bound, bound),
        "wv": jax.random.uniform(keys[4], (D, D), jnp.float32, -bound, bound),
        "bv": jax.random.uniform(keys[5], (D,), jnp.float32, -bound, bound),
        "wo": jax.random.uniform(keys[6], (D, D), jnp.float32, -bound, bound),
        "bo": jax.random.uniform(keys[7], (D,), jnp.float32, -bound, bound),
    }

    q = jax.random.normal(keys[8], (B, S, D), jnp.float32)
    k = jax.random.normal(keys[9], (B, S, D), jnp.float32)
    v = jax.random.normal(keys[10], (B, S, D), jnp.float32)

    out = multi_head_attention(q, k, v, params, heads=H)
    out = jax.block_until_ready(out)

    ref = _reference(q, k, v, params, heads=H)
    assert out.shape == (B, S, D)
    # Tolerance accounts for the approx (EUP) reciprocal in the softmax.
    assert jnp.allclose(out, ref, atol=2e-3, rtol=2e-3), "mismatch vs reference"

    print("KERNEL_OK")
</pallas_src>

<mosaic_0001>
module attributes {stable_mosaic.version = 11 : i64} {
  func.func @_qkv_proj_kernel(%arg0: i32, %arg1: i32, %arg2: memref<1x16x32xf32, #tpu.memory_space<vmem>>, %arg3: memref<1x32x32xf32, #tpu.memory_space<vmem>>, %arg4: memref<1x1x32xf32, #tpu.memory_space<vmem>>, %arg5: memref<1x16x32xf32, #tpu.memory_space<vmem>>) attributes {dimension_semantics = [#tpu.dimension_semantics<parallel>, #tpu.dimension_semantics<parallel>], iteration_bounds = array<i64: 3, 1>, scalar_prefetch = 0 : i64, scratch_operands = 0 : i64, tpu.core_type = #tpu.core_type<tc>, window_params = [{transform_indices = @transform_0, window_bounds = array<i64: 1, 16, 32>}, {transform_indices = @transform_1, window_bounds = array<i64: 1, 32, 32>}, {transform_indices = @transform_2, window_bounds = array<i64: 1, 1, 32>}, {transform_indices = @transform_3, window_bounds = array<i64: 1, 16, 32>}]} {
    %c0 = arith.constant 0 : index
    %c0_0 = arith.constant 0 : index
    %c0_1 = arith.constant 0 : index
    %0 = vector.load %arg2[%c0, %c0_0, %c0_1] : memref<1x16x32xf32, #tpu.memory_space<vmem>>, vector<1x16x32xf32>
    %1 = vector.shape_cast %0 : vector<1x16x32xf32> to vector<16x32xf32>
    %c0_2 = arith.constant 0 : index
    %c0_3 = arith.constant 0 : index
    %c0_4 = arith.constant 0 : index
    %2 = vector.load %arg3[%c0_2, %c0_3, %c0_4] : memref<1x32x32xf32, #tpu.memory_space<vmem>>, vector<1x32x32xf32>
    %3 = vector.shape_cast %2 : vector<1x32x32xf32> to vector<32x32xf32>
    %cst = arith.constant dense<0.000000e+00> : vector<16x32xf32>
    %4 = tpu.matmul %1, %3, %cst {dimension_numbers = #tpu.dot_dimension_numbers<[1], [0], [0], [1], [0, 0, 1, 1], [], []>} : vector<16x32xf32>, vector<32x32xf32>, vector<16x32xf32> -> vector<16x32xf32>
    %c0_5 = arith.constant 0 : index
    %c0_6 = arith.constant 0 : index
    %c0_7 = arith.constant 0 : index
    %5 = vector.load %arg4[%c0_5, %c0_6, %c0_7] : memref<1x1x32xf32, #tpu.memory_space<vmem>>, vector<1x1x32xf32>
    %6 = vector.shape_cast %5 : vector<1x1x32xf32> to vector<1x32xf32>
    %7 = vector.broadcast %6 : vector<1x32xf32> to vector<16x32xf32>
    %8 = arith.addf %4, %7 : vector<16x32xf32>
    %c0_8 = arith.constant 0 : index
    %c0_9 = arith.constant 0 : index
    %c0_10 = arith.constant 0 : index
    %9 = vector.load %arg5[%c0_8, %c0_9, %c0_10] : memref<1x16x32xf32, #tpu.memory_space<vmem>>, vector<1x16x32xf32>
    %10 = vector.shape_cast %9 : vector<1x16x32xf32> to vector<16x32xf32>
    %11 = vector.shape_cast %8 : vector<16x32xf32> to vector<1x16x32xf32>
    tpu.vector_store %arg5[%c0_8, %c0_9, %c0_10], %11 {strides = array<i32>} : memref<1x16x32xf32, #tpu.memory_space<vmem>>, vector<1x16x32xf32>,
    return
  }
  func.func @transform_0(%arg0: i32, %arg1: i32) -> (i32, i32, i32) {
    %c0_i32 = arith.constant 0 : i32
    %c0_i32_0 = arith.constant 0 : i32
    return %arg0, %arg1, %c0_i32 : i32, i32, i32
  }
  func.func @transform_1(%arg0: i32, %arg1: i32) -> (i32, i32, i32) {
    %c0_i32 = arith.constant 0 : i32
    %c0_i32_0 = arith.constant 0 : i32
    %c0_i32_1 = arith.constant 0 : i32
    return %arg0, %c0_i32, %c0_i32_0 : i32, i32, i32
  }
  func.func @transform_2(%arg0: i32, %arg1: i32) -> (i32, i32, i32) {
    %c0_i32 = arith.constant 0 : i32
    %c0_i32_0 = arith.constant 0 : i32
    %c0_i32_1 = arith.constant 0 : i32
    return %arg0, %c0_i32, %c0_i32_0 : i32, i32, i32
  }
  func.func @transform_3(%arg0: i32, %arg1: i32) -> (i32, i32, i32) {
    %c0_i32 = arith.constant 0 : i32
    %c0_i32_0 = arith.constant 0 : i32
    return %arg0, %arg1, %c0_i32 : i32, i32, i32
  }
}

</mosaic_0001>

<bundles_post_ra>
// kernel: tpu_custom_call.1
= control target key start
LH: loop header
LB: loop body
LE: loop exit
PB: predicated region body
PF: predicated region fallthrough
CT: control target
= control target key end

     0   :  { %8 = vsyncpa [#allocation3], 0  ;;  %s1029_s0 = inlined_call_operand.hbm [shape: f32[3,16,32], index: 0, kind: input, shape index: {}]   ;;  %s1030_s1 = inlined_call_operand.hbm [shape: f32[3,32,32], index: 1, kind: input, shape index: {}]   ;;  %s1031_s2 = inlined_call_operand.vmem [shape: f32[3,1,32], index: 2, kind: input, shape index: {}]   ;;  %s1032_s3 = inlined_call_operand.hbm [shape: f32[3,16,32], index: 3, kind: output, shape index: {}]  }
   0x1   :  { %10 = vsyncpa [#allocation3 + $0x1], 0 }
   0x2   :  { %11 = vsyncpa [#allocation6], 0 }
   0x3   :  { %13 = vsyncpa [#allocation6 + $0x1], 0 }
   0x4   :  { %14 = vsyncpa [#allocation4], 0 }
   0x5   :  { %16 = vsyncpa [#allocation4 + $0x1], 0  ;;  %s791_s12 = smov 0   ;;  %s793_s13 = smov 0  }
   0x6   :  { %s795_s14 = smov 0   ;;  %s797_s15 = smov 0  }
   0x7   :  { %s799_s16 = smov 0   ;;  %s801_s17 = smov 0  }
   0x8 LB: > { %s495_s18 = sadd.s32 4294967295, %s762_s17   ;;  %s496_s19 = sadd.s32 4294967294, %s762_s17   ;;  %s762_s17 = sphi %s801_s17, %s22_s17   ;;  %s758_s16 = sphi %s799_s16, %s1049_s16   ;;  %s754_s15 = sphi %s797_s15, %s1048_s15   ;;  %s750_s14 = sphi %s795_s14, %s1047_s14   ;;  %s746_s13 = sphi %s793_s13, %s1046_s13   ;;  %s742_s12 = sphi %s791_s12, %s1045_s12  }
   0x9   : > { %s34_s20 = sadd.s32 1, %s758_s16  ;;  %s43_s21 = sadd.s32 1, %s750_s14 }
   0xa   : > { %p36_p0 = scmp.ge.s32.totalorder %s34_s20, 3  ;;  %p50_p1 = scmp.ne.s32.totalorder %s750_s14, %s746_s13 }
   0xb   : > { %p51_p2 = scmp.eq.s32.totalorder %s762_s17, 0  ;;  %p56_p3 = scmp.ne.s32.totalorder %s746_s13, %s742_s12 }
   0xc   : > { %s1051_s20 = smov (%p36_p0, %s34_s20), 0  ;;  %p57_p5 = scmp.eq.s32.totalorder %s495_s18, 0 }
   0xd   : > { %p832_p4 = por %p51_p2, %p50_p1  ;;  %s38_s23 = ssub.s32 %s758_s16, %s1051_s20 }
   0xe   : > { %p134_p6 = scmp.eq.s32.totalorder %s495_s18, 2  ;;  %p41_p7 = scmp.eq.s32.totalorder %s38_s23, 0 }
   0xf   : > { %p838_p8 = por %p57_p5, %p56_p3  ;;  %p140_p10 = scmp.eq.s32.totalorder %s496_s19, 2 }
  0x10   : > { %p842_p9 = por %p134_p6, %p50_p1  ;;  %p562_p12 = scmp.lt.s32.totalorder %s762_s17, 3 }
  0x11   : > { %s1036_s24 = scalar_select %p838_p8, 1, 0 }
  0x12   : > { %s1037_s25 = scalar_select %p842_p9, 1, 0 }
  0x13   : > { %s847_s26 = scalar_select %p41_p7, %s750_s14, %s43_s21  }
  0x14   : > { %p849_p11 = por %p140_p10, %p56_p3  ;;  %s855_s28 = sand.u32 1, %s750_s14  }
  0x15   : > { %s499_s29 = sshll.u32 %s855_s28, 4  ;;  %s517_s30 = sshll.u32 %s758_s16, 8 }
  0x16   : > { %s1038_s27 = scalar_select %p849_p11, 1, 0 }
  0x17   : > { %s862_s6 = scalar_lea.hbm %s1029_s0, %s517_s30  ;;  %s164_s7 = scalar_lea.vmem [#allocation2], %s499_s29 }
  0x18   : > { %s173_s8 = sshll.u32 %s164_s7, 4  ;;  %p868_p13 = pnand %p562_p12, %p832_p4  ;;  %s864_s8 = int_to_ptr.vmem [resolvable:$true] %s173_s8 }
  0x19   : > { %s161_s10 = scalar_lea.sflag [#allocation3], %s855_s28  ;;  %s616_s11 = scalar_lea.hbm %s862_s6, 256 }
  0x1a   : > { %p617_p1 = scmp.ne.s32.totalorder %s862_s6, %s616_s11  ;;  %p618_p2 = pneg %p868_p13 }
  0x1b   : > { %s621_s21 = scalar_lea.hbm %s1029_s0, 768  ;;  %p622_p4 = scmp.lt.u32.totalorder %s862_s6, %s1029_s0 }
  0x1c   : > { %p619_p3 = pnand %p618_p2, %p617_p1  ;;  %p623_p6 = scmp.lt.u32.totalorder %s621_s21, %s616_s11 }
  0x1d   : > { %p625_p10 = scmp.lt.u32.totalorder %s616_s11, %s862_s6 }
  0x1e   : > { %p620_p5 = pneg %p619_p3  ;;  %p624_p7 = por %p623_p6, %p622_p4 }
  0x20   : > { %p626_p12 = por %p625_p10, %p624_p7 }
  0x22   : > { %p627_p0 = pnand %p626_p12, %p620_p5 }
  0x24   : > { %630 = shalt.err (!%p627_p0)
}
  0x25   : > { %s631_s29 = scalar_lea.vmem %s864_s8, 256  ;;  %s764_s30 = smov [#allocation2]  }
  0x26   : > { %p632_p1 = scmp.ne.s32.totalorder %s864_s8, %s631_s29  ;;  %s636_s4 = sshll.u32 %s764_s30, 4  ;;  %s637_s4 = int_to_ptr.vmem [resolvable:$false] %s636_s4 }
  0x27   : > { %s638_s5 = scalar_lea.vmem %s637_s4, 512  ;;  %p639_p9 = scmp.lt.s32.totalorder %s864_s8, %s637_s4 }
  0x28   : > { %p634_p3 = pnand %p632_p1, %p618_p2  ;;  %p640_p4 = scmp.lt.s32.totalorder %s638_s5, %s631_s29 }
  0x2a   : > { %p635_p11 = pneg %p634_p3  ;;  %p641_p6 = por %p640_p4, %p639_p9 }
  0x2c   : > { %p642_p7 = pnand %p641_p6, %p635_p11 }
  0x2e   : > { %645 = shalt.err (!%p642_p7)
}
  0x2f   : > { %s765_s7 = smov 128   ;;  %s766_s11 = smov 8  }
  0x30   : > { %554 = dma.hbm_to_vmem [thread:$0]  (!%p868_p13), %s862_s6, 256, %s864_s8, %s161_s10, %s765_s7, %s765_s7, %s766_s11  }
  0x31   : > { %p208_p9 = scmp.lt.s32.totalorder %s762_s17, 4  ;;  %s502_s18 = sshll.u32 %s855_s28, 5 }
  0x32   : > { %s518_s19 = sshll.u32 %s758_s16, 9  ;;  %p1040_p11 = scmp.ge.s32.totalorder %s762_s17, 1 }
  0x33   : > { %s916_s29 = scalar_lea.hbm %s1030_s1, %s518_s19  ;;  %s187_s30 = scalar_lea.vmem [#allocation5], %s502_s18 }
  0x34   : > { %p909_p0 = pnand %p1040_p11, %p208_p9  ;;  %s194_s4 = sshll.u32 %s187_s30, 4  ;;  %s918_s4 = int_to_ptr.vmem [resolvable:$true] %s194_s4 }
  0x35   : > { %s184_s6 = scalar_lea.sflag [#allocation6], %s855_s28  ;;  %s646_s8 = scalar_lea.hbm %s916_s29, 512 }
  0x36   : > { %p647_p5 = scmp.ne.s32.totalorder %s916_s29, %s646_s8  ;;  %s651_s19 = scalar_lea.hbm %s1030_s1, 1536 }
  0x37   : > { %p652_p1 = scmp.lt.u32.totalorder %s916_s29, %s1030_s1  ;;  %p653_p3 = scmp.lt.u32.totalorder %s651_s19, %s646_s8 }
  0x38   : > { %p649_p10 = pnand %p647_p5, %p618_p2  ;;  %p655_p6 = scmp.lt.u32.totalorder %s646_s8, %s916_s29 }
  0x39   : > { %p654_p4 = por %p653_p3, %p652_p1 }
  0x3a   : > { %p650_p12 = pneg %p649_p10 }
  0x3b   : > { %p656_p7 = por %p655_p6, %p654_p4 }
  0x3d   : > { %p657_p9 = pnand %p656_p7, %p650_p12 }
  0x3f   : > { %660 = shalt.err (!%p657_p9)
}
  0x40   : > { %s661_s18 = scalar_lea.vmem %s918_s4, 512  ;;  %s767_s30 = smov [#allocation5]  }
  0x41   : > { %p662_p11 = scmp.ne.s32.totalorder %s918_s4, %s661_s18  ;;  %s666_s10 = sshll.u32 %s767_s30, 4  ;;  %s667_s10 = int_to_ptr.vmem [resolvable:$false] %s666_s10 }
  0x42   : > { %s668_s5 = scalar_lea.vmem %s667_s10, 1024  ;;  %p669_p8 = scmp.lt.s32.totalorder %s918_s4, %s667_s10 }
  0x43   : > { %p664_p5 = pnand %p662_p11, %p618_p2  ;;  %p670_p1 = scmp.lt.s32.totalorder %s668_s5, %s661_s18 }
  0x45   : > { %p665_p10 = pneg %p664_p5  ;;  %p671_p3 = por %p670_p1, %p669_p8 }
  0x47   : > { %p672_p4 = pnand %p671_p3, %p665_p10 }
  0x49   : > { %675 = shalt.err (!%p672_p4)
}
  0x4a   : > { %557 = dma.hbm_to_vmem [thread:$0]  (!%p868_p13), %s916_s29, 512, %s918_s4, %s184_s6, %s765_s7, %s765_s7, %s766_s11  }
  0x4b   : > { %212 = sbr.rel (%p909_p0) target bundleno = 327 (0x147), region = 32  ;;  %s952_s8 = sand.u32 (!%p909_p0), 1, %s746_s13  }
  0x4c   : > { %s506_s19 = sshll.u32 (!%p909_p0), %s952_s8, 4  ;;  %s215_s22 = scalar_lea.sflag (!%p909_p0), [#allocation3], %s952_s8 }
  0x4d   : > { %s218_s9 = scalar_lea.vmem (!%p909_p0), [#allocation2], %s506_s19  ;;  %p1042_p8 = scmp.ne.s32.totalorder (!%p909_p0), %s1036_s24, 0 }
  0x52   : > { %729 = dma.done.wait (%p1042_p8), %s215_s22, 256  }
  0x53   : > { %731 = vsyncadd (%p1042_p8), %s215_s22, 4294967040  ;;  %s507_s28 = sshll.u32 %s952_s8, 5  ;;  %s224_s7 = scalar_lea.sflag [#allocation6], %s952_s8 }
  0x54   : > { %s227_s11 = scalar_lea.vmem [#allocation5], %s507_s28 }
  0x55   : > { %733 = dma.done.wait (%p1042_p8), %s224_s7, 512  }
  0x56   : > { %735 = vsyncadd (%p1042_p8), %s224_s7, 4294966784  ;;  %vm276_vm0 = vcmask 261120   ;;  %v265_v0 = vld [vmem:[%s227_s11] sm:$0xff]  ;;  %v266_v1 = vld [vmem:[%s227_s11 + $0x8] sm:$0xff]  ;;  %p259_p13 = scmp.lt.s32.totalorder %s754_s15, 2  ;;  %s257_s6 = scalar_lea.vmem [#allocation7], %s506_s19 }
  0x57   : > { %v267_v2 = vld [vmem:[%s227_s11 + $0x10] sm:$0xff]  ;;  %v537_v3 = vpack.c.bf16 %v266_v1, %v265_v0  ;;  %v268_v4 = vld [vmem:[%s227_s11 + $0x18] sm:$0xff]  ;;  %s376_s23 = sshll.u32 %s257_s6, 4  ;;  %s519_s18 = sshll.u32 %s754_s15, 8  ;;  %s974_s23 = int_to_ptr.vmem [resolvable:$true] %s376_s23 }
  0x58   : > { %v263_v5 = vld [vmem:[%s218_s9] sm:$0xff]  ;;  %v541_v6 = vpack.c.bf16 %v268_v4, %v267_v2  ;;  %v264_v7 = vld [vmem:[%s218_s9 + $0x8] sm:$0xff]  ;;  %s260_s24 = scalar_select %p259_p13, %s754_s15, 2 }
  0x59   : > { %534 = vmatprep.mubr.msk.f32.mxu0 %vm276_vm0, %v263_v5  ;;  %538 = vmatprep.subr.bf16.mxu0 %v537_v3  ;;  %s979_s5 = scalar_lea.hbm %s1032_s3, %s519_s18  ;;  %s361_s19 = scalar_lea.sflag [#allocation4], %s952_s8 }
  0x5a   : > { %540 = vmatpush3.bf16.msra.mxu0 %v537_v3  ;;  %s261_s4 = scalar_lea.vmem %s1031_s2, %s260_s24  ;;  %s676_s15 = scalar_lea.vmem %s974_s23, 256 }
  0x5b   : > { %542 = vmatprep.subr.bf16.mxu0 %v541_v6  ;;  %v509_v8 = vld [vmem:[%s261_s4] ss:$0 sm:$0xff]  ;;  %p677_p2 = scmp.ne.s32.totalorder %s974_s23, %s676_s15  ;;  %p1043_p0 = scmp.ne.s32.totalorder %s1037_s25, 0 }
  0x5c   : > { %s768_s22 = smov [#allocation7]  }
  0x5d   : > { %p678_p12 = pnand %p677_p2, %p1043_p0  ;;  %s680_s9 = sshll.u32 %s768_s22, 4  ;;  %s681_s9 = int_to_ptr.vmem [resolvable:$false] %s680_s9 }
  0x5e   : > { %544 = vmatpush3.bf16.msra.mxu0 %v541_v6  ;;  %s682_s28 = scalar_lea.vmem %s681_s9, 512  ;;  %p683_p7 = scmp.lt.s32.totalorder %s974_s23, %s681_s9 }
  0x5f   : > { %p679_p6 = pneg %p678_p12  ;;  %p684_p9 = scmp.lt.s32.totalorder %s682_s28, %s676_s15 }
  0x61   : > { %535 = vmatmul.mubr.msk.f32.vlgmr.msra.gmra.mrb[0].mxu0 %vm276_vm0, %v264_v7  ;;  %p685_p11 = por %p684_p9, %p683_p7 }
  0x63   : > { %p686_p5 = pnand %p685_p11, %p679_p6 }
 0x134   : > { %v536_v9 = vpop.f32.mrb[0].mxu0 }
 0x135   : > { %v355_v10 = vadd.f32 %v536_v9, %v509_v8  ;;  %v349_v11 = vpop.f32.mrb[1].mxu0 }
 0x136   : > { %v350_v12 = vadd.f32 %v509_v8, %v349_v11 }
 0x137   : > { %359 = vst.msk [vmem:[%s257_s6 + $0x8] sm:$0xff] %vm276_vm0, %v355_v10 }
 0x138   : > { %358 = vst.msk [vmem:[%s257_s6] sm:$0xff] %vm276_vm0, %v350_v12 }
 0x139   : > { %689 = shalt.err (!%p686_p5)
}
 0x13a   : > { %s690_s7 = scalar_lea.hbm %s979_s5, 256  ;;  %s694_s21 = scalar_lea.hbm %s1032_s3, 768 }
 0x13b   : > { %p691_p10 = scmp.ne.s32.totalorder %s979_s5, %s690_s7  ;;  %p695_p4 = scmp.lt.u32.totalorder %s979_s5, %s1032_s3 }
 0x13c   : > { %p696_p8 = scmp.lt.u32.totalorder %s694_s21, %s690_s7  ;;  %p698_p2 = scmp.lt.u32.totalorder %s690_s7, %s979_s5 }
 0x13d   : > { %p692_p1 = pnand %p691_p10, %p1043_p0 }
 0x13e   : > { %p697_p13 = por %p696_p8, %p695_p4 }
 0x13f   : > { %p693_p3 = pneg %p692_p1 }
 0x140   : > { %p699_p12 = por %p698_p2, %p697_p13 }
 0x142   : > { %p700_p6 = pnand %p699_p12, %p693_p3 }
 0x144   : > { %703 = shalt.err (!%p700_p6)
}
 0x145   : > { %s769_s6 = smov 128   ;;  %s770_s18 = smov 8  }
 0x146   : > { %549 = dma.vmem_to_hbm [thread:$0]  (%p1043_p0), %s974_s23, 256, %s979_s5, %s361_s19, %s769_s6, %s769_s6, %s770_s18  }
 0x147 PF: > { %p563_p7 = scmp.ge.s32.totalorder %s762_s17, 2  ;;  %s391_s30 = sand.u32 1, %s742_s12  }
 0x148   : > { %p1044_p9 = scmp.ne.s32.totalorder %s1038_s27, 0  ;;  %s392_s10 = scalar_lea.sflag [#allocation4], %s391_s30 }
 0x14a   : > { %p559_p11 = pnand %p563_p7, %p1044_p9 }
 0x14c   : > { %737 = dma.done.wait (!%p559_p11), %s392_s10, 256  }
 0x14d   : > { %739 = vsyncadd (!%p559_p11), %s392_s10, 4294967040  ;;  %s22_s17 = sadd.s32 1, %s762_s17   ;;  %s1045_s12 = smov %s746_s13 }
 0x14e   : > { %p19_p5 = scmp.ge.s32.totalorder %s22_s17, 5   ;;  %s1046_s13 = smov %s750_s14 }
 0x14f   : > { %s1047_s14 = smov %s847_s26  ;;  %s1048_s15 = smov %s758_s16 }
 0x150   : > { %s1049_s16 = smov %s1051_s20  ;;  %21 = sbr.rel (!%p19_p5) target bundleno = 8 (0x8), region = 93 }
 0x157   :  { %397 = vsyncpa [#allocation3], 1 }
 0x158   :  { %399 = vsyncpa [#allocation3 + $0x1], 1 }
 0x159   :  { %400 = vsyncpa [#allocation6], 1 }
 0x15a   :  { %402 = vsyncpa [#allocation6 + $0x1], 1 }
 0x15b   :  { %403 = vsyncpa [#allocation4], 1 }
 0x15c   :  { %405 = vsyncpa [#allocation4 + $0x1], 1 }

</bundles_post_ra>
